<compile_context>
chip_gen: v5e
topology: v5e:2x2
jax: 0.10.0
libtpu: 0.0.40
codegen_flags: <defaults>
</compile_context>

<pallas_src>
import jax
import jax.numpy as jnp
from jax.experimental import pallas as pl
from jax.experimental.pallas import tpu as pltpu


_BLOCK_BUDGET_BYTES = 6 * 1024 * 1024    # 3-layer input bytes per grid step
_VMEM_LIMIT_BYTES = 32 * 1024 * 1024     # explicit: v5e default (16 MiB) is too small
_MIN_GRID_STEPS = 4                      # megacore sharding + DMA/compute overlap
_SMALL_FASTPATH_ELEMS = 1 << 15          # below this, plain XLA beats kernel launch


def _cdiv(a, b):
    return -(-a // b)


def _round_up(x, m):
    return _cdiv(x, m) * m


def _choose_sublane_tile(rows, row_bytes, budget=_BLOCK_BUDGET_BYTES):
    """Tile for a dim sitting in the block's second-to-last position.

    Must be a multiple of 8 or equal to `rows`.  Sized from the VMEM budget,
    and capped so the grid gets at least ~_MIN_GRID_STEPS steps when possible.
    """
    if rows <= 8:
        return rows                                           # full extent
    cap = max(8, (budget // max(row_bytes, 1)) // 8 * 8)
    target = _round_up(_cdiv(rows, _MIN_GRID_STEPS), 8)
    return max(8, min(cap, target))


def _choose_batch_tile(rows, row_bytes, budget=_BLOCK_BUDGET_BYTES):
    """Tile for a leading (layout-unconstrained) dim."""
    cap = max(1, budget // max(row_bytes, 1))
    target = max(1, _cdiv(rows, _MIN_GRID_STEPS))
    return max(1, min(rows, cap, target))


# ---------------------------------------------------------------------------
# Kernels
# ---------------------------------------------------------------------------

def _elmo_rows_kernel(coeff_ref, x_ref, o_ref):
    """3D path. x_ref: (TILE_B, 3*E) (layer slabs contiguous along lanes),
    o_ref: (TILE_B, E), coeff_ref: (3,) f32 in SMEM (= softmax(S)*gamma)."""
    e = o_ref.shape[-1]
    x0 = x_ref[:, 0 * e:1 * e]
    x1 = x_ref[:, 1 * e:2 * e]
    x2 = x_ref[:, 2 * e:3 * e]
    if x_ref.dtype != jnp.float32:
        x0 = x0.astype(jnp.float32)
        x1 = x1.astype(jnp.float32)
        x2 = x2.astype(jnp.float32)
    acc = coeff_ref[0] * x0 + coeff_ref[1] * x1 + coeff_ref[2] * x2
    o_ref[...] = acc.astype(o_ref.dtype)


def _elmo_seq_kernel(coeff_ref, x_ref, o_ref):
    """4D path. x_ref: (TILE_B, 3, TILE_S, E); o_ref: (TILE_B, TILE_S, E);
    coeff_ref: (3,) f32 in SMEM.  Layer dim is a non-minor dim -> cheap slices."""
    x0 = x_ref[:, 0]
    x1 = x_ref[:, 1]
    x2 = x_ref[:, 2]
    if x_ref.dtype != jnp.float32:
        x0 = x0.astype(jnp.float32)
        x1 = x1.astype(jnp.float32)
        x2 = x2.astype(jnp.float32)
    acc = coeff_ref[0] * x0 + coeff_ref[1] * x1 + coeff_ref[2] * x2
    o_ref[...] = acc.astype(o_ref.dtype)


# ---------------------------------------------------------------------------
# Wrappers
# ---------------------------------------------------------------------------

def _elmo_ws_3d(x, coeff):
    b, n_layers, e = x.shape
    assert n_layers == 3
    itemsize = jnp.dtype(x.dtype).itemsize
    x2 = x.reshape(b, 3 * e)                      # free: contiguous reshape

    tile_b = _choose_sublane_tile(b, 3 * e * itemsize)
    grid_b = _cdiv(b, tile_b)                     # ragged tail handled by masking

    cost = pl.CostEstimate(
        flops=5 * b * e, transcendentals=0,
        bytes_accessed=4 * b * e * itemsize)

    return pl.pallas_call(
        _elmo_rows_kernel,
        out_shape=jax.ShapeDtypeStruct((b, e), x.dtype),
        grid=(grid_b,),
        in_specs=[
            pl.BlockSpec(memory_space=pltpu.MemorySpace.SMEM),   # coeff (3,)
            pl.BlockSpec((tile_b, 3 * e), lambda i: (i, 0)),     # x rows
        ],
        out_specs=pl.BlockSpec((tile_b, e), lambda i: (i, 0)),   # lane-dense
        compiler_params=pltpu.CompilerParams(
            dimension_semantics=("parallel",),
            vmem_limit_bytes=_VMEM_LIMIT_BYTES),
        cost_estimate=cost,
    )(coeff, x2)


def _elmo_ws_4d(x, coeff):
    b, n_layers, s, e = x.shape
    assert n_layers == 3
    itemsize = jnp.dtype(x.dtype).itemsize

    per_seq_row = 3 * e * itemsize                # one seq position, all layers
    if s * per_seq_row > _BLOCK_BUDGET_BYTES:
        # long sequences: tile the seq dim, one batch element per block
        tile_b = 1
        tile_s = _choose_sublane_tile(s, per_seq_row)
    else:
        # short sequences: take the full seq and tile over batch instead
        tile_s = s
        eff_s = _round_up(s, 8)                   # conservative sublane padding
        tile_b = _choose_batch_tile(b, 3 * eff_s * e * itemsize)

    grid = (_cdiv(b, tile_b), _cdiv(s, tile_s))   # ragged tails masked by Pallas

    cost = pl.CostEstimate(
        flops=5 * b * s * e, transcendentals=0,
        bytes_accessed=4 * b * s * e * itemsize)

    return pl.pallas_call(
        _elmo_seq_kernel,
        out_shape=jax.ShapeDtypeStruct((b, s, e), x.dtype),
        grid=grid,
        in_specs=[
            pl.BlockSpec(memory_space=pltpu.MemorySpace.SMEM),               # coeff
            pl.BlockSpec((tile_b, 3, tile_s, e),
                         lambda bi, si: (bi, 0, si, 0)),                     # x
        ],
        out_specs=pl.BlockSpec((tile_b, tile_s, e),
                               lambda bi, si: (bi, si, 0)),
        compiler_params=pltpu.CompilerParams(
            dimension_semantics=("parallel", "parallel"),
            vmem_limit_bytes=_VMEM_LIMIT_BYTES),
        cost_estimate=cost,
    )(coeff, x)


def _elmo_small(x, coeff):
    """Tiny-input fast path: pallas_call launch overhead dominates; use XLA."""
    xf = x.astype(jnp.float32)
    if x.ndim == 3:
        out = jnp.einsum("ble,l->be", xf, coeff)
    else:
        out = jnp.einsum("blse,l->bse", xf, coeff)
    return out.astype(x.dtype)


def elmo_weighted_sum(x, S_param, gamma):
    """Forward pass of ELMoWeightedSum.

    x:       (B, 3, E) or (B, 3, seq, E)
    S_param: (1, 3)  layer-mixing logits
    gamma:   (1,)    global scale
    """
    if x.ndim not in (3, 4):
        raise ValueError(f"Wrong input dimension: x.ndim = {x.ndim}")
    if x.shape[1] != 3:
        raise ValueError(f"Expected 3 layers on axis 1, got {x.shape[1]}")

    # 3-element softmax + gamma fold: tiny, done in the wrapper; the per-element
    # weighted sum (the hot path) runs inside the Pallas kernel.
    coeff = (jax.nn.softmax(S_param.astype(jnp.float32), axis=1)[0]
             * gamma.astype(jnp.float32)[0]).astype(jnp.float32)     # (3,)

    if x.size <= _SMALL_FASTPATH_ELEMS:
        return _elmo_small(x, coeff)
    if x.ndim == 3:
        return _elmo_ws_3d(x, coeff)
    return _elmo_ws_4d(x, coeff)


# ---------------------------------------------------------------------------
# Pure-JAX reference (mirrors the PyTorch forward)
# ---------------------------------------------------------------------------

def elmo_weighted_sum_ref(x, S_param, gamma):
    w = jax.nn.softmax(S_param.astype(jnp.float32), axis=1)[0]       # (3,)
    xf = x.astype(jnp.float32)
    if x.ndim == 3:
        out = jnp.einsum("ble,l->be", xf, w) * gamma.astype(jnp.float32)[0]
    else:
        out = jnp.einsum("blse,l->bse", xf, w) * gamma.astype(jnp.float32)[0]
    return out.astype(x.dtype)


if __name__ == "__main__":
    key = jax.random.PRNGKey(0)
    k_g, k_s, k3, k4, k4b, k3s = jax.random.split(key, 6)

    gamma = jax.random.normal(k_g, (1,), jnp.float32)
    S_param = jax.random.normal(k_s, (1, 3), jnp.float32)

    E = 768                                      # lane-aligned (multiple of 128)

    # 3D Pallas path: batch not a multiple of the row tile -> masked tail block.
    B3 = 44
    x3 = jax.random.normal(k3, (B3, 3, E), jnp.float32)

    # 4D Pallas path: short, non-multiple-of-8 seq -> full-seq, batch-tiled blocks.
    B4, S4 = 3, 20
    x4 = jax.random.normal(k4, (B4, 3, S4, E), jnp.float32)

    # 4D Pallas path in bf16: f32 accumulation inside the kernel.
    x4b = jax.random.normal(k4b, (4, 3, 40, 512), jnp.float32).astype(jnp.bfloat16)

    # Tiny input: exercises the XLA fast path (same semantics, no Pallas).
    x3s = jax.random.normal(k3s, (2, 3, 256), jnp.float32)

    out3 = jax.block_until_ready(elmo_weighted_sum(x3, S_param, gamma))
    out4 = jax.block_until_ready(elmo_weighted_sum(x4, S_param, gamma))
    out4b = jax.block_until_ready(elmo_weighted_sum(x4b, S_param, gamma))
    out3s = jax.block_until_ready(elmo_weighted_sum(x3s, S_param, gamma))

    ref3 = elmo_weighted_sum_ref(x3, S_param, gamma)
    ref4 = elmo_weighted_sum_ref(x4, S_param, gamma)
    ref4b = elmo_weighted_sum_ref(x4b, S_param, gamma)
    ref3s = elmo_weighted_sum_ref(x3s, S_param, gamma)

    assert out3.shape == (B3, E), out3.shape
    assert out4.shape == (B4, S4, E), out4.shape
    assert out4b.shape == (4, 40, 512), out4b.shape
    assert out3s.shape == (2, 256), out3s.shape

    assert jnp.allclose(out3, ref3, atol=1e-5, rtol=1e-5)
    assert jnp.allclose(out4, ref4, atol=1e-5, rtol=1e-5)
    assert jnp.allclose(out4b.astype(jnp.float32), ref4b.astype(jnp.float32),
                        atol=5e-2, rtol=5e-2)
    assert jnp.allclose(out3s, ref3s, atol=1e-5, rtol=1e-5)

    print("KERNEL_OK")
</pallas_src>

<mosaic_0001>
module attributes {stable_mosaic.version = 11 : i64} {
  func.func @_elmo_rows_kernel(%arg0: i32, %arg1: memref<3xf32, #tpu.memory_space<smem>>, %arg2: memref<16x2304xf32, #tpu.memory_space<vmem>>, %arg3: memref<16x768xf32, #tpu.memory_space<vmem>>) attributes {dimension_semantics = [#tpu.dimension_semantics<parallel>], iteration_bounds = array<i64: 3>, scalar_prefetch = 0 : i64, scratch_operands = 0 : i64, tpu.core_type = #tpu.core_type<tc>, window_params = [{transform_indices = @transform_0, window_bounds = array<i64: 3>}, {transform_indices = @transform_1, window_bounds = array<i64: 16, 2304>}, {transform_indices = @transform_2, window_bounds = array<i64: 16, 768>}]} {
    %c0 = arith.constant 0 : index
    %c0_0 = arith.constant 0 : index
    %0 = vector.load %arg2[%c0, %c0_0] : memref<16x2304xf32, #tpu.memory_space<vmem>>, vector<16x768xf32>
    %c0_1 = arith.constant 0 : index
    %c768 = arith.constant 768 : index
    %1 = vector.load %arg2[%c0_1, %c768] : memref<16x2304xf32, #tpu.memory_space<vmem>>, vector<16x768xf32>
    %c0_2 = arith.constant 0 : index
    %c1536 = arith.constant 1536 : index
    %2 = vector.load %arg2[%c0_2, %c1536] : memref<16x2304xf32, #tpu.memory_space<vmem>>, vector<16x768xf32>
    %c0_3 = arith.constant 0 : index
    %3 = memref.load %arg1[%c0_3] : memref<3xf32, #tpu.memory_space<smem>>
    %4 = vector.broadcast %3 : f32 to vector<16x768xf32>
    %5 = arith.mulf %4, %0 : vector<16x768xf32>
    %c1 = arith.constant 1 : index
    %6 = memref.load %arg1[%c1] : memref<3xf32, #tpu.memory_space<smem>>
    %7 = vector.broadcast %6 : f32 to vector<16x768xf32>
    %8 = arith.mulf %7, %1 : vector<16x768xf32>
    %9 = arith.addf %5, %8 : vector<16x768xf32>
    %c2 = arith.constant 2 : index
    %10 = memref.load %arg1[%c2] : memref<3xf32, #tpu.memory_space<smem>>
    %11 = vector.broadcast %10 : f32 to vector<16x768xf32>
    %12 = arith.mulf %11, %2 : vector<16x768xf32>
    %13 = arith.addf %9, %12 : vector<16x768xf32>
    %c0_4 = arith.constant 0 : index
    %c0_5 = arith.constant 0 : index
    %14 = vector.load %arg3[%c0_4, %c0_5] : memref<16x768xf32, #tpu.memory_space<vmem>>, vector<16x768xf32>
    tpu.vector_store %arg3[%c0_4, %c0_5], %13 {strides = array<i32>} : memref<16x768xf32, #tpu.memory_space<vmem>>, vector<16x768xf32>,
    return
  }
  func.func @transform_0(%arg0: i32) -> i32 {
    %c0_i32 = arith.constant 0 : i32
    %c0_i32_0 = arith.constant 0 : i32
    return %c0_i32 : i32
  }
  func.func @transform_1(%arg0: i32) -> (i32, i32) {
    %c0_i32 = arith.constant 0 : i32
    %c0_i32_0 = arith.constant 0 : i32
    return %arg0, %c0_i32 : i32, i32
  }
  func.func @transform_2(%arg0: i32) -> (i32, i32) {
    %c0_i32 = arith.constant 0 : i32
    %c0_i32_0 = arith.constant 0 : i32
    return %arg0, %c0_i32 : i32, i32
  }
}

</mosaic_0001>

<bundles_post_ra>
// kernel: tpu_custom_call.1
= control target key start
LH: loop header
LB: loop body
LE: loop exit
PB: predicated region body
PF: predicated region fallthrough
CT: control target
= control target key end

     0   :  { %7 = vsyncpa [#allocation5], 0  ;;  %s856_s0 = inlined_call_operand.hbm [shape: f32[3], index: 0, kind: input, shape index: {}]   ;;  %s857_s1 = inlined_call_operand.hbm [shape: f32[44,2304], index: 1, kind: input, shape index: {}]   ;;  %s858_s2 = inlined_call_operand.hbm [shape: f32[44,768], index: 2, kind: output, shape index: {}]  }
   0x1   :  { %8 = vsyncpa [#allocation3], 0 }
   0x2   :  { %10 = vsyncpa [#allocation3 + $0x1], 0 }
   0x3   :  { %11 = vsyncpa [#allocation4], 0 }
   0x4   :  { %13 = vsyncpa [#allocation4 + $0x1], 0  ;;  %s616_s9 = smov 0   ;;  %s618_s10 = smov 0  }
   0x5   :  { %s620_s11 = smov 0   ;;  %s622_s12 = smov 0  }
   0x6 LB: > { %s637_s13 = sadd.s32 4294967295, %s594_s12   ;;  %s397_s14 = sadd.s32 4294967294, %s594_s12   ;;  %s594_s12 = sphi %s622_s12, %s868_s12   ;;  %s590_s11 = sphi %s620_s11, %s867_s11   ;;  %s586_s10 = sphi %s618_s10, %s866_s10   ;;  %s582_s9 = sphi %s616_s9, %s865_s9  }
   0x7   : > { %s641_s15 = sadd.s32 1, %s594_s12   ;;  %s47_s16 = sadd.s32 1, %s590_s11 }
   0x8   : > { %s44_s17 = ssub.s32 %s594_s12, %s641_s15  ;;  %p54_p0 = scmp.ne.s32.totalorder %s590_s11, %s586_s10 }
   0x9   : > { %p45_p1 = scmp.eq.s32.totalorder %s44_s17, 0  ;;  %p55_p2 = scmp.eq.s32.totalorder %s594_s12, 0 }
   0xa   : > { %p60_p3 = scmp.ne.s32.totalorder %s586_s10, %s582_s9  ;;  %p61_p4 = scmp.eq.s32.totalorder %s637_s13, 0 }
   0xb   : > { %s653_s18 = scalar_select %p45_p1, %s590_s11, %s47_s16  }
   0xc   : > { %p655_p5 = por %p55_p2, %p54_p0  ;;  %p661_p6 = por %p61_p4, %p60_p3 }
   0xd   : > { %p84_p7 = scmp.eq.s32.totalorder %s637_s13, 2  ;;  %p90_p8 = scmp.eq.s32.totalorder %s397_s14, 2 }
   0xe   : > { %p398_p9 = scmp.ge.s32.totalorder %s594_s12, 1  ;;  %p97_p10 = scmp.lt.s32.totalorder %s594_s12, 4 }
   0xf   : > { %p668_p11 = por %p84_p7, %p54_p0  ;;  %p672_p12 = por %p90_p8, %p60_p3 }
  0x10   : > { %p676_p13 = pnand %p398_p9, %p97_p10  ;;  %s109_s26 = sshll.u32 %s856_s0, 4  ;;  %s110_s26 = int_to_ptr.hbm [resolvable:$true] %s109_s26 }
  0x11   : > { %p439_p0 = scmp.lt.s32.totalorder %s594_s12, 3  ;;  %s120_s27 = sand.u32 1, %s590_s11  }
  0x12   : > { %p426_p1 = pneg %p676_p13  ;;  %s413_s29 = smul.u32 288, %s120_s27 }
  0x13   : > { %p691_p3 = pnand %p439_p0, %p655_p5  ;;  %s596_s30 = smov [#allocation2]  }
  0x14   : > { %p427_p2 = pnand %p426_p1, %p61_p4  ;;  %s414_s3 = smul.u32 288, %s594_s12 }
  0x15   : > { %s124_s4 = scalar_lea.vmem [#allocation6], %s413_s29  ;;  %s121_s16 = scalar_lea.sflag [#allocation3], %s120_s27 }
  0x16   : > { %429 = dma.hbm_to_smem (!%p427_p2), %s110_s26, 16, %s596_s30, [#allocation5]  }
  0x17   : > { %s133_s5 = sshll.u32 %s124_s4, 4  ;;  %s130_s8 = scalar_lea.hbm %s857_s1, %s414_s3  ;;  %s134_s5 = int_to_ptr.vmem [resolvable:$true] %s133_s5 }
  0x18   : > { %s131_s14 = sshll.u32 %s130_s8, 4  ;;  %p498_p7 = pneg %p691_p3  ;;  %s132_s14 = int_to_ptr.hbm [resolvable:$true] %s131_s14 }
  0x19   : > { %s494_s17 = sshra.s32 %s132_s14, 4  ;;  %s501_s26 = scalar_lea.hbm %s857_s1, 864  ;;  %s495_s17 = int_to_ptr.hbm [resolvable:$true] %s494_s17 }
  0x1a   : > { %s496_s19 = scalar_lea.hbm %s495_s17, 288  ;;  %p502_p10 = scmp.lt.s32.totalorder %s495_s17, %s857_s1 }
  0x1b   : > { %p497_p5 = scmp.ne.s32.totalorder %s495_s17, %s496_s19  ;;  %p503_p1 = scmp.lt.s32.totalorder %s501_s26, %s496_s19 }
  0x1d   : > { %p499_p8 = pnand %p498_p7, %p497_p5  ;;  %p504_p0 = por %p503_p1, %p502_p10 }
  0x1f   : > { %p500_p9 = pneg %p499_p8 }
  0x21   : > { %p505_p2 = pnand %p504_p0, %p500_p9 }
  0x23   : > { %508 = shalt.err (!%p505_p2)
}
  0x24   : > { %s597_s27 = smov 2304   ;;  %s598_s3 = smov 144  }
  0x25   : > { %433 = dma.hbm_to_vmem [thread:$0]  (!%p691_p3), %s132_s14, 4608, %s134_s5, %s121_s16, %s597_s27, %s597_s27, %s598_s3  }
  0x26   : > { %145 = sbr.rel (%p676_p13) target bundleno = 81 (0x51), region = 28 }
  0x2b   : > { %569 = dma.done.wait (%p61_p4), [#allocation5], 16  }
  0x2c   : > { %571 = vsyncadd (%p61_p4), [#allocation5], 4294967280  ;;  %s716_s4 = sand.u32 1, %s586_s10  }
  0x2d   : > { %s415_s6 = smul.u32 288, %s716_s4  ;;  %s153_s7 = scalar_lea.sflag [#allocation3], %s716_s4 }
  0x2f   : > { %s720_s8 = scalar_lea.vmem [#allocation6], %s415_s6 }
  0x30   : > { %573 = dma.done.wait (%p661_p6), %s153_s7, 4608  }
  0x31   : > { %575 = vsyncadd (%p661_p6), %s153_s7, 4294962688 }
  0x32   : > { %162 = sfence }
  0x33   : > { %s217_s23 = sld [smem:[#allocation2]]  ;;  %v181_v0 = vld [vmem:[%s720_s8] sm:$0xff]  ;;  %v193_v1 = vld [vmem:[%s720_s8 + $0x30] sm:$0xff]  ;;  %v182_v2 = vld [vmem:[%s720_s8 + $0x8] sm:$0xff]  ;;  %s416_s20 = smul.u32 96, %s716_s4 }
  0x34   : > { %s406_s28 = sld [smem:[#allocation2 + $0x1]]  ;;  %v183_v3 = vld [vmem:[%s720_s8 + $0x10] sm:$0xff]  ;;  %v205_v4 = vld [vmem:[%s720_s8 + $0x60] sm:$0xff]  ;;  %v194_v5 = vld [vmem:[%s720_s8 + $0x38] sm:$0xff]  ;;  %s417_s16 = smul.u32 96, %s637_s13 }
  0x35   : > { %s407_s5 = sld [smem:[#allocation2 + $0x2]]  ;;  %v195_v6 = vld [vmem:[%s720_s8 + $0x40] sm:$0xff]  ;;  %v206_v8 = vld [vmem:[%s720_s8 + $0x68] sm:$0xff]  ;;  %v207_v9 = vld [vmem:[%s720_s8 + $0x70] sm:$0xff]  ;;  %s779_s14 = scalar_lea.vmem [#allocation7], %s416_s20 }
  0x36   : > { %v184_v10 = vld [vmem:[%s720_s8 + $0x18] sm:$0xff]  ;;  %v196_v15 = vld [vmem:[%s720_s8 + $0x48] sm:$0xff]  ;;  %v185_v21 = vld [vmem:[%s720_s8 + $0x20] sm:$0xff]  ;;  %s308_s24 = scalar_lea.hbm %s858_s2, %s417_s16  ;;  %s309_s13 = sshll.u32 %s779_s14, 4  ;;  %s310_s13 = int_to_ptr.vmem [resolvable:$true] %s309_s13 }
  0x37   : > { %v208_v16 = vld [vmem:[%s720_s8 + $0x78] sm:$0xff]  ;;  %v197_v22 = vld [vmem:[%s720_s8 + $0x50] sm:$0xff]  ;;  %v209_v23 = vld [vmem:[%s720_s8 + $0x80] sm:$0xff]  ;;  %s311_s25 = sshll.u32 %s308_s24, 4  ;;  %s296_s26 = scalar_lea.sflag [#allocation4], %s716_s4  ;;  %s312_s25 = int_to_ptr.hbm [resolvable:$true] %s311_s25 }
  0x38   : > { %v186_v32 = vld [vmem:[%s720_s8 + $0x28] sm:$0xff]  ;;  %v198_v33 = vld [vmem:[%s720_s8 + $0x58] sm:$0xff]  ;;  %v187_v39 = vld [vmem:[%s720_s8 + $0x90] sm:$0xff]  ;;  %s538_s29 = sshra.s32 %s312_s25, 4  ;;  %s544_s6 = scalar_lea.hbm %s858_s2, 288  ;;  %s539_s29 = int_to_ptr.hbm [resolvable:$true] %s538_s29 }
  0x39   : > { %v733_v7 = vstv %s217_s23  ;;  %v210_v34 = vld [vmem:[%s720_s8 + $0x88] sm:$0xff]  ;;  %v199_v40 = vld [vmem:[%s720_s8 + $0xc0] sm:$0xff]  ;;  %v211_v41 = vld [vmem:[%s720_s8 + $0xf0] sm:$0xff]  ;;  %s540_s30 = scalar_lea.hbm %s539_s29, 96  ;;  %p545_p3 = scmp.lt.s32.totalorder %s539_s29, %s858_s2 }
  0x3a   : > { %v219_v11 = vmul.f32 %v733_v7, %v181_v0  ;;  %v740_v12 = vstv %s406_s28  ;;  %v220_v13 = vmul.f32 %v733_v7, %v182_v2  ;;  %v221_v14 = vmul.f32 %v733_v7, %v183_v3  ;;  %v188_v46 = vld [vmem:[%s720_s8 + $0x98] sm:$0xff]  ;;  %v200_v47 = vld [vmem:[%s720_s8 + $0xc8] sm:$0xff]  ;;  %v189_v53 = vld [vmem:[%s720_s8 + $0xa0] sm:$0xff]  ;;  %p541_p4 = scmp.ne.s32.totalorder %s539_s29, %s540_s30  ;;  %p546_p5 = scmp.lt.s32.totalorder %s544_s6, %s540_s30 }
  0x3b   : > { %v233_v17 = vmul.f32 %v740_v12, %v193_v1  ;;  %v747_v18 = vstv %s407_s5  ;;  %v234_v19 = vmul.f32 %v740_v12, %v194_v5  ;;  %v235_v20 = vmul.f32 %v740_v12, %v195_v6  ;;  %v212_v52 = vld [vmem:[%s720_s8 + $0xf8] sm:$0xff]  ;;  %v201_v54 = vld [vmem:[%s720_s8 + $0xd0] sm:$0xff]  ;;  %v213_v59 = vld [vmem:[%s720_s8 + $0x100] sm:$0xff] }
  0x3c   : > { %v259_v24 = vmul.f32 %v747_v18, %v205_v4  ;;  %v260_v25 = vmul.f32 %v747_v18, %v206_v8  ;;  %v261_v26 = vmul.f32 %v747_v18, %v207_v9  ;;  %v222_v27 = vmul.f32 %v733_v7, %v184_v10  ;;  %v190_v60 = vld [vmem:[%s720_s8 + $0xa8] sm:$0xff]  ;;  %v202_v1 = vld [vmem:[%s720_s8 + $0xd8] sm:$0xff]  ;;  %v191_v8 = vld [vmem:[%s720_s8 + $0xb0] sm:$0xff]  ;;  %p542_p6 = pnand %p541_p4, %p668_p11  ;;  %p547_p7 = por %p546_p5, %p545_p3 }
  0x3d   : > { %v245_v28 = vadd.f32 %v233_v17, %v219_v11  ;;  %v246_v29 = vadd.f32 %v234_v19, %v220_v13  ;;  %v247_v30 = vadd.f32 %v235_v20, %v221_v14  ;;  %v236_v31 = vmul.f32 %v740_v12, %v196_v15  ;;  %v214_v2 = vld [vmem:[%s720_s8 + $0x108] sm:$0xff]  ;;  %v203_v9 = vld [vmem:[%s720_s8 + $0xe0] sm:$0xff]  ;;  %v215_v10 = vld [vmem:[%s720_s8 + $0x110] sm:$0xff] }
  0x3e   : > { %v262_v35 = vmul.f32 %v747_v18, %v208_v16  ;;  %v223_v36 = vmul.f32 %v733_v7, %v185_v21  ;;  %v237_v37 = vmul.f32 %v740_v12, %v197_v22  ;;  %v263_v38 = vmul.f32 %v747_v18, %v209_v23  ;;  %v192_v16 = vld [vmem:[%s720_s8 + $0xb8] sm:$0xff]  ;;  %v204_v17 = vld [vmem:[%s720_s8 + $0xe8] sm:$0xff]  ;;  %p543_p13 = pneg %p542_p6 }
  0x3f   : > { %v271_v42 = vadd.f32 %v259_v24, %v245_v28  ;;  %v272_v43 = vadd.f32 %v260_v25, %v246_v29  ;;  %v273_v44 = vadd.f32 %v261_v26, %v247_v30  ;;  %v248_v45 = vadd.f32 %v236_v31, %v222_v27  ;;  %v216_v23 = vld [vmem:[%s720_s8 + $0x118] sm:$0xff] }
  0x40   : > { %v249_v48 = vadd.f32 %v237_v37, %v223_v36  ;;  %v224_v49 = vmul.f32 %v733_v7, %v186_v32  ;;  %v238_v50 = vmul.f32 %v740_v12, %v198_v33  ;;  %v264_v51 = vmul.f32 %v747_v18, %v210_v34  ;;  %p548_p8 = pnand %p547_p7, %p543_p13 }
  0x41   : > { %283 = vst [vmem:[%s779_s14] sm:$0xff] %v271_v42  ;;  %v274_v55 = vadd.f32 %v262_v35, %v248_v45  ;;  %v225_v56 = vmul.f32 %v733_v7, %v187_v39  ;;  %v239_v57 = vmul.f32 %v740_v12, %v199_v40  ;;  %v265_v58 = vmul.f32 %v747_v18, %v211_v41 }
  0x42   : > { %284 = vst [vmem:[%s779_s14 + $0x8] sm:$0xff] %v272_v43  ;;  %v275_v61 = vadd.f32 %v263_v38, %v249_v48  ;;  %v250_v62 = vadd.f32 %v238_v50, %v224_v49  ;;  %v226_v63 = vmul.f32 %v733_v7, %v188_v46  ;;  %v240_v0 = vmul.f32 %v740_v12, %v200_v47 }
  0x43   : > { %285 = vst [vmem:[%s779_s14 + $0x10] sm:$0xff] %v273_v44  ;;  %v251_v3 = vadd.f32 %v239_v57, %v225_v56  ;;  %v266_v4 = vmul.f32 %v747_v18, %v212_v52  ;;  %v227_v5 = vmul.f32 %v733_v7, %v189_v53  ;;  %v241_v6 = vmul.f32 %v740_v12, %v201_v54 }
  0x44   : > { %286 = vst [vmem:[%s779_s14 + $0x18] sm:$0xff] %v274_v55  ;;  %v276_v11 = vadd.f32 %v264_v51, %v250_v62  ;;  %v252_v13 = vadd.f32 %v240_v0, %v226_v63  ;;  %v267_v14 = vmul.f32 %v747_v18, %v213_v59  ;;  %v228_v15 = vmul.f32 %v733_v7, %v190_v60 }
  0x45   : > { %287 = vst [vmem:[%s779_s14 + $0x20] sm:$0xff] %v275_v61  ;;  %v277_v19 = vadd.f32 %v265_v58, %v251_v3  ;;  %v253_v20 = vadd.f32 %v241_v6, %v227_v5  ;;  %v242_v21 = vmul.f32 %v740_v12, %v202_v1  ;;  %v268_v22 = vmul.f32 %v747_v18, %v214_v2 }
  0x46   : > { %288 = vst [vmem:[%s779_s14 + $0x28] sm:$0xff] %v276_v11  ;;  %v278_v24 = vadd.f32 %v266_v4, %v252_v13  ;;  %v229_v25 = vmul.f32 %v733_v7, %v191_v8  ;;  %v243_v26 = vmul.f32 %v740_v12, %v203_v9  ;;  %v269_v27 = vmul.f32 %v747_v18, %v215_v10 }
  0x47   : > { %289 = vst [vmem:[%s779_s14 + $0x30] sm:$0xff] %v277_v19  ;;  %v279_v28 = vadd.f32 %v267_v14, %v253_v20  ;;  %v254_v29 = vadd.f32 %v242_v21, %v228_v15  ;;  %v230_v30 = vmul.f32 %v733_v7, %v192_v16  ;;  %v244_v31 = vmul.f32 %v740_v12, %v204_v17 }
  0x48   : > { %290 = vst [vmem:[%s779_s14 + $0x38] sm:$0xff] %v278_v24  ;;  %v255_v32 = vadd.f32 %v243_v26, %v229_v25  ;;  %v270_v33 = vmul.f32 %v747_v18, %v216_v23 }
  0x49   : > { %291 = vst [vmem:[%s779_s14 + $0x40] sm:$0xff] %v279_v28  ;;  %v280_v34 = vadd.f32 %v268_v22, %v254_v29  ;;  %v256_v35 = vadd.f32 %v244_v31, %v230_v30 }
  0x4a   : > { %v281_v36 = vadd.f32 %v269_v27, %v255_v32 }
  0x4b   : > { %292 = vst [vmem:[%s779_s14 + $0x48] sm:$0xff] %v280_v34  ;;  %v282_v37 = vadd.f32 %v270_v33, %v256_v35 }
  0x4c   : > { %293 = vst [vmem:[%s779_s14 + $0x50] sm:$0xff] %v281_v36 }
  0x4d   : > { %294 = vst [vmem:[%s779_s14 + $0x58] sm:$0xff] %v282_v37 }
  0x4e   : > { %551 = shalt.err (!%p548_p8)
}
  0x4f   : > { %s599_s4 = smov 768   ;;  %s600_s23 = smov 48  }
  0x50   : > { %424 = dma.vmem_to_hbm [thread:$0]  (%p668_p11), %s310_s13, 1536, %s312_s25, %s296_s26, %s599_s4, %s599_s4, %s600_s23  }
  0x51 PF: > { %p441_p9 = scmp.ge.s32.totalorder %s594_s12, 2  ;;  %s326_s28 = sand.u32 1, %s582_s9  }
  0x52   : > { %s327_s5 = scalar_lea.sflag [#allocation4], %s326_s28 }
  0x53   : > { %p435_p10 = pnand %p441_p9, %p672_p12 }
  0x55   : > { %p436_p1 = pneg %p435_p10 }
  0x57   : > { %577 = dma.done.wait (%p436_p1), %s327_s5, 1536  }
  0x58   : > { %579 = vsyncadd (%p436_p1), %s327_s5, 4294965760  ;;  %p16_p0 = scmp.ge.s32.totalorder %s641_s15, 5   ;;  %s865_s9 = smov %s586_s10 }
  0x59   : > { %s866_s10 = smov %s590_s11  ;;  %s867_s11 = smov %s653_s18 }
  0x5a   : > { %s868_s12 = smov %s641_s15  ;;  %18 = sbr.rel (!%p16_p0) target bundleno = 6 (0x6), region = 78 }
  0x5f   :  { %333 = vsyncpa [#allocation3], 1 }
  0x60   :  { %335 = vsyncpa [#allocation3 + $0x1], 1 }
  0x61   :  { %336 = vsyncpa [#allocation4], 1 }
  0x62   :  { %338 = vsyncpa [#allocation4 + $0x1], 1 }
  0x63   :  { %339 = vsyncpa [#allocation5], 1 }
  0x64   :  { %341 = vsyncpa [#allocation5 + $0x1], 1 }

</bundles_post_ra>
